<compile_context>
chip_gen: v6e
topology: v6e:2x2x1
jax: 0.10.0
libtpu: 0.0.40
codegen_flags: <defaults>
</compile_context>

<pallas_src>
import jax
import jax.numpy as jnp
from jax.experimental import pallas as pl
from jax.experimental.pallas import tpu as pltpu

HIDDEN = 40
HID_PAD = 128          # hidden width padded to a full lane width (40 -> 128)
TILE_B_MAX = 2048      # per-step batch tile cap (VMEM use stays at a few MB)
ALIGN_B = 16           # bf16 sublane packing is (16, 128)
COMPUTE_DTYPE = jnp.bfloat16   # MXU inputs; accumulation stays f32 everywhere


def _round_up(x, m):
    return (x + m - 1) // m * m


def _tile_and_pad(B):
    """Pick (tile_b, b_pad). Keeps >=2 grid steps once B is non-trivial so the
    'parallel' grid axis can shard across v7x's two TensorCores."""
    b_al = _round_up(B, ALIGN_B)
    if b_al <= 2 * ALIGN_B:
        tile_b = b_al                                   # tiny batch: one step
    elif b_al <= 2 * TILE_B_MAX:
        tile_b = _round_up(pl.cdiv(b_al, 2), ALIGN_B)   # 2 (even) grid steps
    else:
        tile_b = TILE_B_MAX
    b_pad = _round_up(b_al, tile_b)
    return tile_b, b_pad


def dqn_kernel(x_ref, w1_ref, w2_ref, w3_ref, o_ref):
    # x_ref: (tile_b, in_dim+1), trailing column is the constant-1 bias lane.
    # w*_ref: bias-folded, zero-padded weights (see pack_params).
    dt = w1_ref.dtype
    h1 = jnp.maximum(
        jnp.dot(x_ref[...], w1_ref[...], preferred_element_type=jnp.float32),
        0.0).astype(dt)
    h2 = jnp.maximum(
        jnp.dot(h1, w2_ref[...], preferred_element_type=jnp.float32),
        0.0).astype(dt)
    # Narrow (tile_b, n_actions) f32 store: only real action columns hit HBM.
    o_ref[...] = jnp.dot(h2, w3_ref[...], preferred_element_type=jnp.float32)


def dqn_forward(x, packed_params, n_actions):
    w1p, w2p, w3p = packed_params
    cdt = w1p.dtype
    B, in_dim = x.shape
    in_aug = in_dim + 1

    tile_b, b_pad = _tile_and_pad(B)

    # One fused cast+pad: batch rows padded with 0, one appended bias column
    # of exactly 1 (padded rows' outputs are sliced away below).
    x_aug = jnp.pad(x.astype(cdt), ((0, b_pad - B), (0, 1)),
                    constant_values=((0, 0), (0, 1)))

    out = pl.pallas_call(
        dqn_kernel,
        out_shape=jax.ShapeDtypeStruct((b_pad, n_actions), jnp.float32),
        grid=(b_pad // tile_b,),
        in_specs=[
            pl.BlockSpec((tile_b, in_aug), lambda i: (i, 0)),
            pl.BlockSpec(w1p.shape, lambda i: (0, 0)),   # resident across grid
            pl.BlockSpec(w2p.shape, lambda i: (0, 0)),
            pl.BlockSpec(w3p.shape, lambda i: (0, 0)),
        ],
        out_specs=pl.BlockSpec((tile_b, n_actions), lambda i: (i, 0)),
        compiler_params=pltpu.CompilerParams(
            dimension_semantics=("parallel",),
            vmem_limit_bytes=32 * 1024 * 1024),
    )(x_aug, w1p, w2p, w3p)

    return out[:B]


def init_params(key, in_dim, n_actions):
    # Matches DQN.__init__: fc1/fc2 weights N(0.5, 0.1), fc3 weights N(-10, 1);
    # biases keep the PyTorch Linear default U(-1/sqrt(fan_in), 1/sqrt(fan_in)).
    ks = jax.random.split(key, 6)
    # PyTorch weight shape is (out, in); store transposed (in, out).
    w1 = (0.5 + 0.1 * jax.random.normal(ks[0], (HIDDEN, in_dim))).T
    w2 = (0.5 + 0.1 * jax.random.normal(ks[1], (HIDDEN, HIDDEN))).T
    w3 = (-10.0 + 1.0 * jax.random.normal(ks[2], (n_actions, HIDDEN))).T
    b1 = jax.random.uniform(ks[3], (HIDDEN,), minval=-1.0, maxval=1.0) / jnp.sqrt(in_dim)
    b2 = jax.random.uniform(ks[4], (HIDDEN,), minval=-1.0, maxval=1.0) / jnp.sqrt(HIDDEN)
    b3 = jax.random.uniform(ks[5], (n_actions,), minval=-1.0, maxval=1.0) / jnp.sqrt(HIDDEN)
    return tuple(p.astype(jnp.float32) for p in (w1, b1, w2, b2, w3, b3))


def pack_params(params, compute_dtype=COMPUTE_DTYPE):
    """Fold biases into the pre-transposed weights.

    x gets a trailing constant-1 column; the last *row* of each packed weight
    carries the bias. The last padded hidden lane (HID_PAD-1) is wired to stay
    exactly 1 through every layer (relu(1)=1), so it keeps acting as the bias
    lane for the next matmul. Hidden dims pad to 128 lanes; the final weight
    stays (HID_PAD, n_actions) so the kernel output is already narrow.
    """
    w1, b1, w2, b2, w3, b3 = params
    in_dim = w1.shape[0]
    n_actions = w3.shape[1]

    w1p = jnp.zeros((in_dim + 1, HID_PAD), jnp.float32)
    w1p = w1p.at[:in_dim, :HIDDEN].set(w1)
    w1p = w1p.at[in_dim, :HIDDEN].set(b1)
    w1p = w1p.at[in_dim, HID_PAD - 1].set(1.0)      # propagate the ones lane

    w2p = jnp.zeros((HID_PAD, HID_PAD), jnp.float32)
    w2p = w2p.at[:HIDDEN, :HIDDEN].set(w2)
    w2p = w2p.at[HID_PAD - 1, :HIDDEN].set(b2)
    w2p = w2p.at[HID_PAD - 1, HID_PAD - 1].set(1.0)

    w3p = jnp.zeros((HID_PAD, n_actions), jnp.float32)
    w3p = w3p.at[:HIDDEN, :].set(w3)
    w3p = w3p.at[HID_PAD - 1, :].set(b3)

    return (w1p.astype(compute_dtype),
            w2p.astype(compute_dtype),
            w3p.astype(compute_dtype))


def reference_forward(x, params):
    # Original f32 module semantics.
    w1, b1, w2, b2, w3, b3 = params
    h1 = jnp.maximum(x @ w1 + b1, 0.0)
    h2 = jnp.maximum(h1 @ w2 + b2, 0.0)
    return h2 @ w3 + b3


def reference_forward_packed(x, packed_params):
    # Same math (and same bf16 quantization) as the kernel, in plain jnp.
    w1p, w2p, w3p = packed_params
    cdt = w1p.dtype
    x_aug = jnp.concatenate([x.astype(cdt), jnp.ones((x.shape[0], 1), cdt)], axis=1)
    h1 = jnp.maximum(jnp.dot(x_aug, w1p, preferred_element_type=jnp.float32),
                     0.0).astype(cdt)
    h2 = jnp.maximum(jnp.dot(h1, w2p, preferred_element_type=jnp.float32),
                     0.0).astype(cdt)
    return jnp.dot(h2, w3p, preferred_element_type=jnp.float32)


if __name__ == "__main__":
    key = jax.random.PRNGKey(0)
    k_x, k_x2, k_p = jax.random.split(key, 3)

    in_dim, n_actions = 4, 3
    params = init_params(k_p, in_dim, n_actions)
    packed = pack_params(params, COMPUTE_DTYPE)

    ok = True
    for kx, batch in ((k_x, 8), (k_x2, 40)):   # 40 exercises the 2-step grid
        x = jax.random.normal(kx, (batch, in_dim), dtype=jnp.float32)

        out = dqn_forward(x, packed, n_actions)
        out = jax.block_until_ready(out)
        assert out.shape == (batch, n_actions)

        # 1) Kernel vs identical-math reference (same dtype/packing): tight.
        ref_packed = reference_forward_packed(x, packed)
        ok &= bool(jnp.allclose(out, ref_packed, rtol=1e-3, atol=1e-3))

        # 2) Kernel vs original f32 module semantics: tolerance covers bf16
        #    quantization of weights/activations.
        ref_f32 = reference_forward(x, params)
        ok &= bool(jnp.allclose(out, ref_f32, rtol=5e-2, atol=5e-2))

    assert ok
    print("KERNEL_OK")
</pallas_src>

<mosaic_0001>
module attributes {stable_mosaic.version = 11 : i64} {
  func.func @dqn_kernel(%arg0: i32, %arg1: memref<16x5xbf16, #tpu.memory_space<vmem>>, %arg2: memref<5x128xbf16, #tpu.memory_space<vmem>>, %arg3: memref<128x128xbf16, #tpu.memory_space<vmem>>, %arg4: memref<128x3xbf16, #tpu.memory_space<vmem>>, %arg5: memref<16x3xf32, #tpu.memory_space<vmem>>) attributes {dimension_semantics = [#tpu.dimension_semantics<parallel>], iteration_bounds = array<i64: 1>, scalar_prefetch = 0 : i64, scratch_operands = 0 : i64, tpu.core_type = #tpu.core_type<tc>, window_params = [{transform_indices = @transform_0, window_bounds = array<i64: 16, 5>}, {pipeline_mode = #tpu.pipeline_mode<synchronous>, transform_indices = @transform_1, window_bounds = array<i64: 5, 128>}, {pipeline_mode = #tpu.pipeline_mode<synchronous>, transform_indices = @transform_2, window_bounds = array<i64: 128, 128>}, {pipeline_mode = #tpu.pipeline_mode<synchronous>, transform_indices = @transform_3, window_bounds = array<i64: 128, 3>}, {transform_indices = @transform_4, window_bounds = array<i64: 16, 3>}]} {
    %c0 = arith.constant 0 : index
    %c0_0 = arith.constant 0 : index
    %0 = vector.load %arg1[%c0, %c0_0] : memref<16x5xbf16, #tpu.memory_space<vmem>>, vector<16x5xbf16>
    %c0_1 = arith.constant 0 : index
    %c0_2 = arith.constant 0 : index
    %1 = vector.load %arg2[%c0_1, %c0_2] : memref<5x128xbf16, #tpu.memory_space<vmem>>, vector<5x128xbf16>
    %cst = arith.constant dense<0.000000e+00> : vector<16x128xf32>
    %2 = tpu.matmul %0, %1, %cst {dimension_numbers = #tpu.dot_dimension_numbers<[1], [0], [0], [1], [0, 0, 1, 1], [], []>} : vector<16x5xbf16>, vector<5x128xbf16>, vector<16x128xf32> -> vector<16x128xf32>
    %cst_3 = arith.constant 0.000000e+00 : f32
    %3 = vector.broadcast %cst_3 : f32 to vector<16x128xf32>
    %4 = arith.maximumf %2, %3 : vector<16x128xf32>
    %5 = arith.truncf %4 : vector<16x128xf32> to vector<16x128xbf16>
    %c0_4 = arith.constant 0 : index
    %c0_5 = arith.constant 0 : index
    %6 = vector.load %arg3[%c0_4, %c0_5] : memref<128x128xbf16, #tpu.memory_space<vmem>>, vector<128x128xbf16>
    %cst_6 = arith.constant dense<0.000000e+00> : vector<16x128xf32>
    %7 = tpu.matmul %5, %6, %cst_6 {dimension_numbers = #tpu.dot_dimension_numbers<[1], [0], [0], [1], [0, 0, 1, 1], [], []>} : vector<16x128xbf16>, vector<128x128xbf16>, vector<16x128xf32> -> vector<16x128xf32>
    %cst_7 = arith.constant 0.000000e+00 : f32
    %8 = vector.broadcast %cst_7 : f32 to vector<16x128xf32>
    %9 = arith.maximumf %7, %8 : vector<16x128xf32>
    %10 = arith.truncf %9 : vector<16x128xf32> to vector<16x128xbf16>
    %c0_8 = arith.constant 0 : index
    %c0_9 = arith.constant 0 : index
    %11 = vector.load %arg4[%c0_8, %c0_9] : memref<128x3xbf16, #tpu.memory_space<vmem>>, vector<128x3xbf16>
    %cst_10 = arith.constant dense<0.000000e+00> : vector<16x3xf32>
    %12 = tpu.matmul %10, %11, %cst_10 {dimension_numbers = #tpu.dot_dimension_numbers<[1], [0], [0], [1], [0, 0, 1, 1], [], []>} : vector<16x128xbf16>, vector<128x3xbf16>, vector<16x3xf32> -> vector<16x3xf32>
    %c0_11 = arith.constant 0 : index
    %c0_12 = arith.constant 0 : index
    %13 = vector.load %arg5[%c0_11, %c0_12] : memref<16x3xf32, #tpu.memory_space<vmem>>, vector<16x3xf32>
    tpu.vector_store %arg5[%c0_11, %c0_12], %12 {strides = array<i32>} : memref<16x3xf32, #tpu.memory_space<vmem>>, vector<16x3xf32>,
    return
  }
  func.func @transform_0(%arg0: i32) -> (i32, i32) {
    %c0_i32 = arith.constant 0 : i32
    %c0_i32_0 = arith.constant 0 : i32
    return %arg0, %c0_i32 : i32, i32
  }
  func.func @transform_1(%arg0: i32) -> (i32, i32) {
    %c0_i32 = arith.constant 0 : i32
    %c0_i32_0 = arith.constant 0 : i32
    %c0_i32_1 = arith.constant 0 : i32
    return %c0_i32, %c0_i32_0 : i32, i32
  }
  func.func @transform_2(%arg0: i32) -> (i32, i32) {
    %c0_i32 = arith.constant 0 : i32
    %c0_i32_0 = arith.constant 0 : i32
    %c0_i32_1 = arith.constant 0 : i32
    return %c0_i32, %c0_i32_0 : i32, i32
  }
  func.func @transform_3(%arg0: i32) -> (i32, i32) {
    %c0_i32 = arith.constant 0 : i32
    %c0_i32_0 = arith.constant 0 : i32
    %c0_i32_1 = arith.constant 0 : i32
    return %c0_i32, %c0_i32_0 : i32, i32
  }
  func.func @transform_4(%arg0: i32) -> (i32, i32) {
    %c0_i32 = arith.constant 0 : i32
    %c0_i32_0 = arith.constant 0 : i32
    return %arg0, %c0_i32 : i32, i32
  }
}

</mosaic_0001>

<bundles_post_ra>
// kernel: tpu_custom_call.1
= control target key start
LH: loop header
LB: loop body
LE: loop exit
PB: predicated region body
PF: predicated region fallthrough
CT: control target
= control target key end

     0   :  { %vm30_vm0 = vcmask 1041408   ;;  %vm31_vm1 = vcmask 1042432   ;;  %v405_v0 = vmov 0.0   ;;  %v406_v2 = vmov 65535   ;;  %s516_s1 = inlined_call_operand.vmem [shape: bf16[5,128], index: 1, kind: input, shape index: {}]   ;;  %s517_s0 = inlined_call_operand.vmem [shape: bf16[16,5], index: 0, kind: input, shape index: {}]   ;;  %s518_s2 = inlined_call_operand.vmem [shape: bf16[128,128], index: 2, kind: input, shape index: {}]   ;;  %s519_s3 = inlined_call_operand.vmem [shape: bf16[128,3], index: 3, kind: input, shape index: {}]   ;;  %s520_s4 = inlined_call_operand.vmem [shape: f32[16,3], index: 4, kind: output, shape index: {}]  }
   0x1   :  { %339 = vmatprep.subr.bf16.mxu0 %v405_v0  ;;  %v20_v1 = vld [vmem:[%s516_s1] sm:$0x7]  ;;  %v32_v3 = vsel %vm30_vm0, 4294967295, %v406_v2  ;;  %345 = vmatprep.subr.bf16.mxu1 %v405_v0  ;;  %vm407_vm2 = vmmov 0   ;;  %v389_v6 = vld [vmem:[%s518_s2 + $0x38] sm:$0xff]   ;;  %v390_v8 = vld [vmem:[%s518_s2 + $0x30] sm:$0xff]  }
   0x2   :  { %v33_v4 = vsel %vm31_vm1, %v32_v3, 0  ;;  %341 = vmatprep.mubr.msk.bf16.mxu0 %vm407_vm2, %v405_v0  ;;  %v388_v5 = vld [vmem:[%s517_s0] sm:$0xff]   ;;  %361 = vmatprep.mubr.msk.bf16.mxu1 %vm407_vm2, %v405_v0  ;;  %vm26_vm3 = vcmask 39936   ;;  %v391_v9 = vld [vmem:[%s518_s2 + $0x28] sm:$0xff]   ;;  %v393_v11 = vld [vmem:[%s518_s2 + $0x18] sm:$0xff]   ;;  %vm294_vm4 = vcmask 23552  }
   0x3   :  { %v35_v7 = vand.u32 %v33_v4, %v20_v1  ;;  %346 = vmatpush3.bf16.msra.mxu1 %v389_v6  ;;  %v392_v10 = vld [vmem:[%s518_s2 + $0x20] sm:$0xff]   ;;  %v394_v12 = vld [vmem:[%s518_s2 + $0x10] sm:$0xff]   ;;  %v395_v13 = vld [vmem:[%s518_s2 + $0x8] sm:$0xff]  }
   0x4   :  { %347 = vmatprep.subr.bf16.mxu1 %v405_v0  ;;  %v396_v14 = vld [vmem:[%s518_s2] sm:$0xff]   ;;  %v397_v15 = vld [vmem:[%s519_s3 + $0x38] sm:$0xff]   ;;  %v398_v16 = vld [vmem:[%s519_s3 + $0x30] sm:$0xff]  }
   0x5   :  { %340 = vmatpush3.bf16.msra.mxu0 %v35_v7  ;;  %v399_v17 = vld [vmem:[%s519_s3 + $0x28] sm:$0xff]   ;;  %v400_v18 = vld [vmem:[%s519_s3 + $0x20] sm:$0xff]   ;;  %v401_v19 = vld [vmem:[%s519_s3 + $0x18] sm:$0xff]  }
   0x6   :  { %365 = vmatprep.subr.bf16.mxu0 %v405_v0  ;;  %v402_v20 = vld [vmem:[%s519_s3 + $0x10] sm:$0xff]   ;;  %v403_v28 = vld [vmem:[%s519_s3 + $0x8] sm:$0xff]   ;;  %v404_v29 = vld [vmem:[%s519_s3] sm:$0xff]  }
   0x7   :  { %348 = vmatpush3.bf16.msra.mxu1 %v390_v8 }
   0x8   :  { %342 = vmatmul.mubr.msk.bf16.vlgmr.msra.gmra.mxu0 %vm26_vm3, %v388_v5  ;;  %349 = vmatprep.subr.bf16.mxu1 %v405_v0 }
   0x9   :  { %381 = vmatprep.mubr.msk.bf16.mxu0 %vm407_vm2, %v405_v0  ;;  %366 = vmatpush3.bf16.msra.mxu0 %v397_v15 }
   0xa   :  { %367 = vmatprep.subr.bf16.mxu0 %v405_v0 }
   0xb   :  { %350 = vmatpush3.bf16.msra.mxu1 %v391_v9 }
   0xc   :  { %351 = vmatprep.subr.bf16.mxu1 %v405_v0 }
   0xd   :  { %368 = vmatpush3.bf16.msra.mxu0 %v398_v16 }
   0xe   :  { %369 = vmatprep.subr.bf16.mxu0 %v405_v0 }
   0xf   :  { %352 = vmatpush3.bf16.msra.mxu1 %v392_v10 }
  0x10   :  { %353 = vmatprep.subr.bf16.mxu1 %v405_v0 }
  0x11   :  { %370 = vmatpush3.bf16.msra.mxu0 %v399_v17 }
  0x12   :  { %371 = vmatprep.subr.bf16.mxu0 %v405_v0 }
  0x13   :  { %354 = vmatpush3.bf16.msra.mxu1 %v393_v11 }
  0x14   :  { %355 = vmatprep.subr.bf16.mxu1 %v405_v0 }
  0x15   :  { %372 = vmatpush3.bf16.msra.mxu0 %v400_v18 }
  0x16   :  { %373 = vmatprep.subr.bf16.mxu0 %v405_v0 }
  0x17   :  { %356 = vmatpush3.bf16.msra.mxu1 %v394_v12 }
  0x18   :  { %357 = vmatprep.subr.bf16.mxu1 %v405_v0 }
  0x19   :  { %374 = vmatpush3.bf16.msra.mxu0 %v401_v19 }
  0x1a   :  { %375 = vmatprep.subr.bf16.mxu0 %v405_v0 }
  0x1b   :  { %358 = vmatpush3.bf16.msra.mxu1 %v395_v13 }
  0x1c   :  { %359 = vmatprep.subr.bf16.mxu1 %v405_v0 }
  0x1d   :  { %376 = vmatpush3.bf16.msra.mxu0 %v402_v20 }
  0x1e   :  { %377 = vmatprep.subr.bf16.mxu0 %v405_v0 }
  0x1f   :  { %360 = vmatpush3.bf16.msra.mxu1 %v396_v14 }
  0x21   :  { %378 = vmatpush3.bf16.msra.mxu0 %v403_v28 }
  0x22   :  { %379 = vmatprep.subr.bf16.mxu0 %v405_v0 }
  0x25   :  { %380 = vmatpush3.bf16.msra.mxu0 %v404_v29 }
  0xc8   :  { %v71_v21 = vpop.f32.mrf.mxu0 }
  0xc9   :  { %v78_v24 = vmax.f32 %v71_v21, 0.0 }
  0xca   :  { %v343_v22 = vpop.f32.mrf.mxu0 }
  0xcc   :  { %v74_v23 = vpop.f32.mrf.mxu0 }
  0xcd   :  { %v79_v25 = vmax.f32 %v74_v23, 0.0 }
  0xce   :  { %v344_v26 = vpop.f32.mrf.mxu0 }
  0xcf   :  { %v80_v27 = vpack.c.bf16 %v79_v25, %v78_v24 }
  0xd1   :  { %362 = vmatmul.mubr.bf16.vlgmr.msra.gmra.mxu1 %v80_v27 }
 0x191   :  { %v179_v30 = vpop.f32.mrf.mxu1 }
 0x192   :  { %v186_v33 = vmax.f32 %v179_v30, 0.0 }
 0x193   :  { %v363_v31 = vpop.f32.mrf.mxu1 }
 0x195   :  { %v182_v32 = vpop.f32.mrf.mxu1 }
 0x196   :  { %v187_v34 = vmax.f32 %v182_v32, 0.0 }
 0x197   :  { %v364_v35 = vpop.f32.mrf.mxu1 }
 0x198   :  { %v188_v36 = vpack.c.bf16 %v187_v34, %v186_v33 }
 0x19a   :  { %382 = vmatmul.mubr.bf16.vlgmr.msra.gmra.mxu0 %v188_v36 }
 0x25a   :  { %v287_v37 = vpop.f32.mrf.mxu0 }
 0x25b   :  { %295 = vst.msk [vmem:[%s520_s4] sm:$0xff] %vm294_vm4, %v287_v37 }
 0x25c   :  { %v383_v38 = vpop.f32.mrf.mxu0 }
 0x25e   :  { %v290_v39 = vpop.f32.mrf.mxu0 }
 0x25f   :  { %296 = vst.msk [vmem:[%s520_s4 + $0x8] sm:$0xff] %vm294_vm4, %v290_v39 }
 0x260   :  { %v384_v40 = vpop.f32.mrf.mxu0 }

</bundles_post_ra>
